<compile_context>
chip_gen: v5e
topology: v5e:2x2
jax: 0.10.0
libtpu: 0.0.40
codegen_flags: <defaults>
</compile_context>

<pallas_src>
import jax
import jax.numpy as jnp
from jax.experimental import pallas as pl
from jax.experimental.pallas import tpu as pltpu


def _precise_reciprocal(d):
    # EUP approximate reciprocal + two Newton-Raphson steps -> full f32 accuracy.
    # (Extra VPU multiplies are free filler: this kernel is HBM-bound.)
    r = pl.reciprocal(d, approx=True)
    r = r * (2.0 - d * r)
    r = r * (2.0 - d * r)
    return r


def lacu_kernel(ab_ref, x_ref, o_ref):
    # ab_ref: (2,) f32 in SMEM -> alpha, beta (scalar loads)
    # x_ref / o_ref: (block_rows, lanes) tile in VMEM
    alpha = ab_ref[0]
    beta = ab_ref[1]

    x = x_ref[...].astype(jnp.float32)
    relu_x = jnp.maximum(x, 0.0)
    relu_neg_x = jnp.maximum(-x, 0.0)

    pos_den = 1.0 + alpha * (relu_neg_x * relu_neg_x)
    neg_den = 1.0 + beta * (relu_x * relu_x)

    out = _precise_reciprocal(pos_den) - _precise_reciprocal(neg_den)
    o_ref[...] = out.astype(o_ref.dtype)


def lacu_orig(x, alpha, beta, *, lanes=512, max_block_rows=1024):
    """Elementwise LACU_orig. x: any shape / float dtype. Same shape/dtype out."""
    orig_shape = x.shape
    orig_dtype = x.dtype
    n = x.size
    if n == 0:
        return x

    # Pack all elements into a lane-dense 2D layout: last dim = 512 lanes
    # (multiple of 128 -> unmasked vst), rows padded up to the block size
    # (multiple of 8 sublanes).  Padding is only materialised when needed.
    rows = pl.cdiv(n, lanes)
    block_rows = min(max_block_rows, ((rows + 7) // 8) * 8)
    rows_padded = pl.cdiv(rows, block_rows) * block_rows
    n_padded = rows_padded * lanes

    flat = jnp.ravel(x)
    if n_padded != n:
        flat = jnp.pad(flat, (0, n_padded - n))
    x2 = flat.reshape(rows_padded, lanes)

    ab = jnp.stack([jnp.asarray(alpha, jnp.float32),
                    jnp.asarray(beta, jnp.float32)])

    grid = (rows_padded // block_rows,)

    out2 = pl.pallas_call(
        lacu_kernel,
        out_shape=jax.ShapeDtypeStruct((rows_padded, lanes), orig_dtype),
        grid=grid,
        in_specs=[
            pl.BlockSpec(memory_space=pltpu.MemorySpace.SMEM),   # alpha/beta
            pl.BlockSpec((block_rows, lanes), lambda i: (i, 0)), # x tiles
        ],
        out_specs=pl.BlockSpec((block_rows, lanes), lambda i: (i, 0)),
        compiler_params=pltpu.CompilerParams(
            dimension_semantics=("parallel",),
            vmem_limit_bytes=32 * 1024 * 1024,
        ),
    )(ab, x2)

    return out2.reshape(-1)[:n].reshape(orig_shape)


if __name__ == "__main__":
    # Small shapes consistent with a SOFTS encoder activation: [B, L, D].
    B, L, D = 2, 8, 32
    key = jax.random.PRNGKey(0)
    x = jax.random.normal(key, (B, L, D), jnp.float32) * 2.0
    alpha, beta = 1.0, 1.0   # nn.Parameter defaults of LACU_orig

    out = lacu_orig(x, alpha, beta)
    jax.block_until_ready(out)

    # Pure-JAX reference matching the PyTorch forward exactly.
    relu_x = jnp.maximum(x, 0.0)
    relu_neg_x = jnp.maximum(-x, 0.0)
    ref = 1.0 / (1.0 + alpha * relu_neg_x * relu_neg_x) \
        - 1.0 / (1.0 + beta * relu_x * relu_x)

    assert out.shape == x.shape and out.dtype == x.dtype
    assert bool(jnp.all(jnp.isfinite(out)))
    assert bool(jnp.allclose(out, ref, atol=1e-5, rtol=1e-5))
    print("KERNEL_OK")
</pallas_src>

<mosaic_0001>
module attributes {stable_mosaic.version = 11 : i64} {
  func.func @lacu_kernel(%arg0: i32, %arg1: memref<2xf32, #tpu.memory_space<smem>>, %arg2: memref<8x512xf32, #tpu.memory_space<vmem>>, %arg3: memref<8x512xf32, #tpu.memory_space<vmem>>) attributes {dimension_semantics = [#tpu.dimension_semantics<parallel>], iteration_bounds = array<i64: 1>, scalar_prefetch = 0 : i64, scratch_operands = 0 : i64, tpu.core_type = #tpu.core_type<tc>, window_params = [{transform_indices = @transform_0, window_bounds = array<i64: 2>}, {transform_indices = @transform_1, window_bounds = array<i64: 8, 512>}, {transform_indices = @transform_2, window_bounds = array<i64: 8, 512>}]} {
    %c0 = arith.constant 0 : index
    %0 = memref.load %arg1[%c0] : memref<2xf32, #tpu.memory_space<smem>>
    %c1 = arith.constant 1 : index
    %1 = memref.load %arg1[%c1] : memref<2xf32, #tpu.memory_space<smem>>
    %c0_0 = arith.constant 0 : index
    %c0_1 = arith.constant 0 : index
    %2 = vector.load %arg2[%c0_0, %c0_1] : memref<8x512xf32, #tpu.memory_space<vmem>>, vector<8x512xf32>
    %cst = arith.constant 0.000000e+00 : f32
    %3 = vector.broadcast %cst : f32 to vector<8x512xf32>
    %4 = arith.maximumf %2, %3 : vector<8x512xf32>
    %cst_2 = arith.constant 0.000000e+00 : f32
    %5 = vector.broadcast %cst_2 : f32 to vector<8x512xf32>
    %6 = arith.subf %5, %2 : vector<8x512xf32>
    %cst_3 = arith.constant 0.000000e+00 : f32
    %7 = vector.broadcast %cst_3 : f32 to vector<8x512xf32>
    %8 = arith.maximumf %6, %7 : vector<8x512xf32>
    %9 = arith.mulf %8, %8 : vector<8x512xf32>
    %10 = vector.broadcast %0 : f32 to vector<8x512xf32>
    %11 = arith.mulf %10, %9 : vector<8x512xf32>
    %cst_4 = arith.constant 1.000000e+00 : f32
    %12 = vector.broadcast %cst_4 : f32 to vector<8x512xf32>
    %13 = arith.addf %12, %11 : vector<8x512xf32>
    %14 = arith.mulf %4, %4 : vector<8x512xf32>
    %15 = vector.broadcast %1 : f32 to vector<8x512xf32>
    %16 = arith.mulf %15, %14 : vector<8x512xf32>
    %cst_5 = arith.constant 1.000000e+00 : f32
    %17 = vector.broadcast %cst_5 : f32 to vector<8x512xf32>
    %18 = arith.addf %17, %16 : vector<8x512xf32>
    %19 = tpu.reciprocal %13 {approx = true} : vector<8x512xf32> -> vector<8x512xf32>
    %20 = arith.mulf %13, %19 : vector<8x512xf32>
    %cst_6 = arith.constant 2.000000e+00 : f32
    %21 = vector.broadcast %cst_6 : f32 to vector<8x512xf32>
    %22 = arith.subf %21, %20 : vector<8x512xf32>
    %23 = arith.mulf %19, %22 : vector<8x512xf32>
    %24 = arith.mulf %13, %23 : vector<8x512xf32>
    %cst_7 = arith.constant 2.000000e+00 : f32
    %25 = vector.broadcast %cst_7 : f32 to vector<8x512xf32>
    %26 = arith.subf %25, %24 : vector<8x512xf32>
    %27 = arith.mulf %23, %26 : vector<8x512xf32>
    %28 = tpu.reciprocal %18 {approx = true} : vector<8x512xf32> -> vector<8x512xf32>
    %29 = arith.mulf %18, %28 : vector<8x512xf32>
    %cst_8 = arith.constant 2.000000e+00 : f32
    %30 = vector.broadcast %cst_8 : f32 to vector<8x512xf32>
    %31 = arith.subf %30, %29 : vector<8x512xf32>
    %32 = arith.mulf %28, %31 : vector<8x512xf32>
    %33 = arith.mulf %18, %32 : vector<8x512xf32>
    %cst_9 = arith.constant 2.000000e+00 : f32
    %34 = vector.broadcast %cst_9 : f32 to vector<8x512xf32>
    %35 = arith.subf %34, %33 : vector<8x512xf32>
    %36 = arith.mulf %32, %35 : vector<8x512xf32>
    %37 = arith.subf %27, %36 : vector<8x512xf32>
    %c0_10 = arith.constant 0 : index
    %c0_11 = arith.constant 0 : index
    %38 = vector.load %arg3[%c0_10, %c0_11] : memref<8x512xf32, #tpu.memory_space<vmem>>, vector<8x512xf32>
    tpu.vector_store %arg3[%c0_10, %c0_11], %37 {strides = array<i32>} : memref<8x512xf32, #tpu.memory_space<vmem>>, vector<8x512xf32>,
    return
  }
  func.func @transform_0(%arg0: i32) -> i32 {
    %c0_i32 = arith.constant 0 : i32
    %c0_i32_0 = arith.constant 0 : i32
    return %c0_i32 : i32
  }
  func.func @transform_1(%arg0: i32) -> (i32, i32) {
    %c0_i32 = arith.constant 0 : i32
    %c0_i32_0 = arith.constant 0 : i32
    return %arg0, %c0_i32 : i32, i32
  }
  func.func @transform_2(%arg0: i32) -> (i32, i32) {
    %c0_i32 = arith.constant 0 : i32
    %c0_i32_0 = arith.constant 0 : i32
    return %arg0, %c0_i32 : i32, i32
  }
}

</mosaic_0001>

<bundles_post_ra>
// kernel: tpu_custom_call.1
= control target key start
LH: loop header
LB: loop body
LE: loop exit
PB: predicated region body
PF: predicated region fallthrough
CT: control target
= control target key end

     0   :  { %7 = vsyncpa [#allocation5], 0  ;;  %s278_s0 = inlined_call_operand.hbm [shape: f32[2], index: 0, kind: input, shape index: {}]   ;;  %s279_s1 = inlined_call_operand.hbm [shape: f32[8,512], index: 1, kind: input, shape index: {}]   ;;  %s280_s2 = inlined_call_operand.hbm [shape: f32[8,512], index: 2, kind: output, shape index: {}]  }
   0x1   :  { %8 = vsyncpa [#allocation3], 0 }
   0x2   :  { %9 = vsyncpa [#allocation4], 0  ;;  %s15_s11 = sshll.u32 %s278_s0, 4  ;;  %s24_s14 = sshll.u32 %s279_s1, 4  ;;  %s16_s11 = int_to_ptr.hbm [resolvable:$true] %s15_s11  ;;  %s25_s14 = int_to_ptr.hbm [resolvable:$true] %s24_s14 }
   0x3   :  { %s251_s15 = smov [#allocation2]   ;;  %s252_s16 = smov [#allocation6]  }
   0x4   :  { %18 = dma.hbm_to_smem %s16_s11, 16, %s251_s15, [#allocation5]  }
   0x5   :  { %s26_s17 = sshll.u32 %s252_s16, 4  ;;  %s27_s17 = int_to_ptr.vmem [resolvable:$true] %s26_s17 }
   0x6   :  { %29 = dma.hbm_to_vmem [thread:$0]  %s25_s14, 512, %s27_s17, [#allocation3]  }
   0x7   :  { %245 = dma.done.wait [#allocation5], 16  }
   0x8   :  { %246 = vsyncadd [#allocation5], 4294967280 }
   0x9   :  { %247 = dma.done.wait [#allocation3], 512  }
   0xa   :  { %248 = vsyncadd [#allocation3], 4294966784 }
   0xb   :  { %38 = sfence }
   0xc   :  { %s39_s18 = sld [smem:[#allocation2]]  ;;  %v41_v0 = vld [vmem:[#allocation6] sm:$0xff]  ;;  %v42_v1 = vld [vmem:[#allocation6 + $0x8] sm:$0xff]  ;;  %v43_v2 = vld [vmem:[#allocation6 + $0x10] sm:$0xff]  ;;  %s253_s1 = smov [#allocation7]  }
   0xd   :  { %s165_s0 = sld [smem:[#allocation2 + $0x1]]  ;;  %v45_v3 = vmax.f32 %v41_v0, 0.0  ;;  %v49_v4 = vsub.f32 0.0, %v41_v0  ;;  %v46_v5 = vmax.f32 %v42_v1, 0.0  ;;  %v50_v6 = vsub.f32 0.0, %v42_v1  ;;  %v44_v9 = vld [vmem:[#allocation6 + $0x18] sm:$0xff] }
   0xe   :  { %v47_v7 = vmax.f32 %v43_v2, 0.0  ;;  %v51_v8 = vsub.f32 0.0, %v43_v2  ;;  %v48_v16 = vmax.f32 %v44_v9, 0.0  ;;  %v52_v17 = vsub.f32 0.0, %v44_v9  ;;  %s152_s19 = sshll.u32 %s253_s1, 4  ;;  %s154_s22 = sshll.u32 %s280_s2, 4  ;;  %s153_s19 = int_to_ptr.vmem [resolvable:$true] %s152_s19  ;;  %s155_s22 = int_to_ptr.hbm [resolvable:$true] %s154_s22 }
   0xf   :  { %v53_v10 = vmax.f32 %v49_v4, 0.0  ;;  %v70_v11 = vmul.f32 %v45_v3, %v45_v3  ;;  %v54_v12 = vmax.f32 %v50_v6, 0.0  ;;  %v71_v13 = vmul.f32 %v46_v5, %v46_v5 }
  0x10   :  { %v55_v14 = vmax.f32 %v51_v8, 0.0  ;;  %v72_v15 = vmul.f32 %v47_v7, %v47_v7  ;;  %v56_v22 = vmax.f32 %v52_v17, 0.0  ;;  %v73_v23 = vmul.f32 %v48_v16, %v48_v16 }
  0x11   :  { %v57_v18 = vmul.f32 %v53_v10, %v53_v10  ;;  %v58_v19 = vmul.f32 %v54_v12, %v54_v12 }
  0x12   :  { %v61_v20 = vstv %s39_s18  ;;  %v59_v21 = vmul.f32 %v55_v14, %v55_v14  ;;  %v60_v33 = vmul.f32 %v56_v22, %v56_v22 }
  0x13   :  { %v62_v24 = vmul.f32 %v61_v20, %v57_v18  ;;  %v74_v25 = vstv %s165_s0  ;;  %v63_v26 = vmul.f32 %v61_v20, %v58_v19 }
  0x14   :  { %v75_v27 = vmul.f32 %v74_v25, %v70_v11  ;;  %v76_v28 = vmul.f32 %v74_v25, %v71_v13  ;;  %v64_v29 = vmul.f32 %v61_v20, %v59_v21  ;;  %v77_v30 = vmul.f32 %v74_v25, %v72_v15 }
  0x15   :  { %v66_v31 = vadd.f32 1.0, %v62_v24  ;;  %v67_v32 = vadd.f32 1.0, %v63_v26  ;;  %v78_v36 = vmul.f32 %v74_v25, %v73_v23  ;;  %v65_v38 = vmul.f32 %v61_v20, %v60_v33 }
  0x16   :  { %v79_v34 = vadd.f32 1.0, %v75_v27  ;;  %v80_v35 = vadd.f32 1.0, %v76_v28  ;;  %v68_v37 = vadd.f32 1.0, %v64_v29  ;;  %v81_v39 = vadd.f32 1.0, %v77_v30 }
  0x17   :  { %169 = vrcp.f32 %v66_v31  ;;  %v69_v40 = vadd.f32 1.0, %v65_v38  ;;  %v82_v41 = vadd.f32 1.0, %v78_v36 }
  0x18   :  { %171 = vrcp.f32 %v79_v34 }
  0x19   :  { %173 = vrcp.f32 %v67_v32 }
  0x1a   :  { %175 = vrcp.f32 %v80_v35 }
  0x1b   :  { %177 = vrcp.f32 %v68_v37 }
  0x1c   :  { %179 = vrcp.f32 %v81_v39 }
  0x1d   :  { %v170_v42 = vpop.eup %169  ;;  %181 = vrcp.f32 %v69_v40 }
  0x1e   :  { %v172_v43 = vpop.eup %171  ;;  %v87_v44 = vmul.f32 %v170_v42, %v66_v31  ;;  %183 = vrcp.f32 %v82_v41 }
  0x1f   :  { %v174_v45 = vpop.eup %173  ;;  %v115_v46 = vmul.f32 %v172_v43, %v79_v34 }
  0x20   :  { %v176_v47 = vpop.eup %175  ;;  %v91_v48 = vsub.f32 2.0, %v87_v44  ;;  %v88_v49 = vmul.f32 %v174_v45, %v67_v32 }
  0x21   :  { %v178_v50 = vpop.eup %177  ;;  %v119_v51 = vsub.f32 2.0, %v115_v46  ;;  %v116_v52 = vmul.f32 %v176_v47, %v80_v35 }
  0x22   :  { %v180_v53 = vpop.eup %179  ;;  %v95_v54 = vmul.f32 %v170_v42, %v91_v48  ;;  %v92_v55 = vsub.f32 2.0, %v88_v49  ;;  %v89_v56 = vmul.f32 %v178_v50, %v68_v37 }
  0x23   :  { %v182_v57 = vpop.eup %181  ;;  %v123_v58 = vmul.f32 %v172_v43, %v119_v51  ;;  %v120_v59 = vsub.f32 2.0, %v116_v52  ;;  %v117_v60 = vmul.f32 %v180_v53, %v81_v39 }
  0x24   :  { %v184_v61 = vpop.eup %183  ;;  %v99_v62 = vmul.f32 %v95_v54, %v66_v31  ;;  %v96_v63 = vmul.f32 %v174_v45, %v92_v55  ;;  %v93_v0 = vsub.f32 2.0, %v89_v56  ;;  %v90_v1 = vmul.f32 %v182_v57, %v69_v40 }
  0x25   :  { %v127_v2 = vmul.f32 %v123_v58, %v79_v34  ;;  %v124_v3 = vmul.f32 %v176_v47, %v120_v59  ;;  %v121_v4 = vsub.f32 2.0, %v117_v60  ;;  %v118_v5 = vmul.f32 %v184_v61, %v82_v41 }
  0x26   :  { %v103_v6 = vsub.f32 2.0, %v99_v62  ;;  %v100_v7 = vmul.f32 %v96_v63, %v67_v32  ;;  %v97_v8 = vmul.f32 %v178_v50, %v93_v0  ;;  %v94_v9 = vsub.f32 2.0, %v90_v1 }
  0x27   :  { %v131_v10 = vsub.f32 2.0, %v127_v2  ;;  %v128_v11 = vmul.f32 %v124_v3, %v80_v35  ;;  %v125_v12 = vmul.f32 %v180_v53, %v121_v4  ;;  %v122_v13 = vsub.f32 2.0, %v118_v5 }
  0x28   :  { %v107_v14 = vmul.f32 %v103_v6, %v95_v54  ;;  %v104_v15 = vsub.f32 2.0, %v100_v7  ;;  %v101_v16 = vmul.f32 %v97_v8, %v68_v37  ;;  %v98_v17 = vmul.f32 %v182_v57, %v94_v9 }
  0x29   :  { %v135_v18 = vmul.f32 %v131_v10, %v123_v58  ;;  %v132_v19 = vsub.f32 2.0, %v128_v11  ;;  %v129_v20 = vmul.f32 %v125_v12, %v81_v39  ;;  %v126_v21 = vmul.f32 %v184_v61, %v122_v13 }
  0x2a   :  { %v108_v22 = vmul.f32 %v104_v15, %v96_v63  ;;  %v105_v23 = vsub.f32 2.0, %v101_v16  ;;  %v102_v24 = vmul.f32 %v98_v17, %v69_v40 }
  0x2b   :  { %v139_v25 = vsub.f32 %v107_v14, %v135_v18  ;;  %v136_v26 = vmul.f32 %v132_v19, %v124_v3  ;;  %v133_v27 = vsub.f32 2.0, %v129_v20  ;;  %v130_v28 = vmul.f32 %v126_v21, %v82_v41 }
  0x2c   :  { %v109_v29 = vmul.f32 %v105_v23, %v97_v8  ;;  %v106_v30 = vsub.f32 2.0, %v102_v24 }
  0x2d   :  { %143 = vst [vmem:[#allocation7] sm:$0xff] %v139_v25  ;;  %v140_v31 = vsub.f32 %v108_v22, %v136_v26  ;;  %v137_v32 = vmul.f32 %v133_v27, %v125_v12  ;;  %v134_v33 = vsub.f32 2.0, %v130_v28 }
  0x2e   :  { %v110_v34 = vmul.f32 %v106_v30, %v98_v17 }
  0x2f   :  { %144 = vst [vmem:[#allocation7 + $0x8] sm:$0xff] %v140_v31  ;;  %v141_v35 = vsub.f32 %v109_v29, %v137_v32  ;;  %v138_v36 = vmul.f32 %v134_v33, %v126_v21 }
  0x31   :  { %145 = vst [vmem:[#allocation7 + $0x10] sm:$0xff] %v141_v35  ;;  %v142_v37 = vsub.f32 %v110_v34, %v138_v36 }
  0x33   :  { %146 = vst [vmem:[#allocation7 + $0x18] sm:$0xff] %v142_v37 }
  0x34   :  { %157 = dma.vmem_to_hbm [thread:$0]  %s153_s19, 512, %s155_s22, [#allocation4]  }
  0x35   :  { %249 = dma.done.wait [#allocation4], 512  }
  0x36   :  { %250 = vsyncadd [#allocation4], 4294966784 }
  0x37   :  { %162 = vsyncpa [#allocation3], 1 }
  0x38   :  { %163 = vsyncpa [#allocation4], 1 }
  0x39   :  { %164 = vsyncpa [#allocation5], 1 }

</bundles_post_ra>
